<compile_context>
chip_gen: v5e
topology: v5e:2x2
jax: 0.10.0
libtpu: 0.0.40
codegen_flags: <defaults>
</compile_context>

<pallas_src>
import functools

import jax
import jax.numpy as jnp
from jax.experimental import pallas as pl
from jax.experimental.pallas import tpu as pltpu


def _round_up(x, m):
    return ((x + m - 1) // m) * m


# -----------------------------------------------------------------------------
# Kernel 1: fused depth net + softmax over depth bins + height compression.
# One grid step = one camera (b, n): full (fH*fW, Cin) pixel slab.
# Fused head weight w_dc = [w_d | w_c | 0-pad]; output lanes are 128-aligned.
# -----------------------------------------------------------------------------
def _depth_height_kernel(feat_ref, se_ref, w_red_ref, b_red_ref,
                         w_dc_ref, b_dc_ref, out_ref,
                         *, fH, fW, inv_fH, depth_channels):
    # 1x1-conv reduce over all fH*fW pixels (bf16 MXU operands, f32 accumulate)
    h = jnp.dot(feat_ref[...], w_red_ref[...], preferred_element_type=jnp.float32)
    h = jnp.maximum(h + b_red_ref[...], 0.0)
    h = h * se_ref[...]                                    # (P, mid) * (1, mid)

    # fused depth/context head: single (P, mid) @ (mid, DCpad) matmul
    dc = jnp.dot(h.astype(jnp.bfloat16), w_dc_ref[...],
                 preferred_element_type=jnp.float32) + b_dc_ref[...]   # (P, DCpad)

    lane = jax.lax.broadcasted_iota(jnp.int32, (1, dc.shape[-1]), 1)
    is_depth = lane < depth_channels

    # softmax over the depth lanes only (f32); non-depth lanes underflow to ~0
    d_masked = jnp.where(is_depth, dc, jnp.float32(-1e30))
    m = jnp.max(d_masked, axis=-1, keepdims=True)
    e = jnp.exp(d_masked - m)
    depth_sm = e * pl.reciprocal(jnp.sum(e, axis=-1, keepdims=True), approx=True)

    # height compression fully in-register: mean over fH of the depth
    # distribution, max over fH of the raw context activations.
    dcp = dc.shape[-1]
    depth_sum = jnp.zeros((fW, dcp), jnp.float32)
    ctx_max = jnp.full((fW, dcp), -1e30, jnp.float32)
    for r in range(fH):                                    # static unroll, fH small
        lo = r * fW
        depth_sum = depth_sum + depth_sm[lo:lo + fW, :]
        ctx_max = jnp.maximum(ctx_max, dc[lo:lo + fW, :])

    out_ref[...] = jnp.where(is_depth, depth_sum * inv_fH, ctx_max)


def depth_height_compress_pallas(feat, se_scale, w_red, b_red, w_dc, b_dc,
                                 *, fH, fW, depth_channels):
    """feat:     (B, N, fH*fW, Cin) bf16 (channels-last pixels)
       se_scale: (B, N, 1, mid)     f32
       w_dc:     (mid, DCpad)       bf16 (DCpad multiple of 128)
       returns   (B, N, fW, DCpad)  f32:
                 [..., :D]        mean over fH of softmax(depth logits)
                 [..., D:D+Cout]  max  over fH of context features
    """
    B, N, P, Cin = feat.shape
    mid = w_red.shape[1]
    DCp = w_dc.shape[1]

    kernel = functools.partial(_depth_height_kernel, fH=fH, fW=fW,
                               inv_fH=1.0 / fH, depth_channels=depth_channels)

    grid_spec = pltpu.PrefetchScalarGridSpec(
        num_scalar_prefetch=0,
        grid=(B, N),                                       # both parallel (megacore)
        in_specs=[
            pl.BlockSpec((None, None, P, Cin), lambda b, n: (b, n, 0, 0)),
            pl.BlockSpec((None, None, 1, mid), lambda b, n: (b, n, 0, 0)),
            pl.BlockSpec((Cin, mid), lambda b, n: (0, 0)),
            pl.BlockSpec((1, mid), lambda b, n: (0, 0)),
            pl.BlockSpec((mid, DCp), lambda b, n: (0, 0)),
            pl.BlockSpec((1, DCp), lambda b, n: (0, 0)),
        ],
        out_specs=pl.BlockSpec((None, None, fW, DCp), lambda b, n: (b, n, 0, 0)),
    )
    return pl.pallas_call(
        kernel,
        out_shape=jax.ShapeDtypeStruct((B, N, fW, DCp), jnp.float32),
        grid_spec=grid_spec,
        compiler_params=pltpu.CompilerParams(
            dimension_semantics=("parallel", "parallel")),
    )(feat, se_scale, w_red, b_red, w_dc, b_dc)


# -----------------------------------------------------------------------------
# Kernel 2: MatrixVT ring & ray projection, lane-dense (C, txy) bf16 output.
#   proj = depth_h @ circle ; proj *= ray ; bev = feat_t @ proj
# NW contraction chunked so the proj intermediate stays small (no VMEM spill).
# -----------------------------------------------------------------------------
def _matrixvt_proj_kernel(depth_ref, feat_t_ref, circle_ref, ray_ref, bev_ref,
                          *, nw_chunk, n_chunks):
    acc = jnp.zeros(bev_ref.shape, jnp.float32)
    for c in range(n_chunks):                              # static unroll, few chunks
        lo = c * nw_chunk
        proj = jnp.dot(depth_ref[lo:lo + nw_chunk, :], circle_ref[...],
                       preferred_element_type=jnp.float32)            # (nwc, txy) f32
        projw = proj.astype(jnp.bfloat16) * ray_ref[lo:lo + nw_chunk, :]  # bf16 weight
        acc = acc + jnp.dot(feat_t_ref[:, lo:lo + nw_chunk], projw,
                            preferred_element_type=jnp.float32)       # (C, txy) f32
    bev_ref[...] = acc.astype(bev_ref.dtype)               # bf16, lane-dense store


def _pick_bev_tile(XY, NW, D, C, *, vmem_budget=24 << 20, cap=4096):
    """Largest multiple-of-128 divisor of XY that (a) keeps the double-buffered
    bf16 ray/circle/out blocks inside `vmem_budget` (conservative for v7x's
    64 MiB VMEM) and (b) leaves >= 2 grid blocks so both TensorCores stay fed."""
    if XY % 128 != 0:
        return XY
    per_col = 2 * 2 * (NW + D + C)          # bytes per BEV column, 2 bufs, bf16
    cap = min(cap, max(128, (vmem_budget // per_col) // 128 * 128))
    best = None
    t = 128
    while t <= min(cap, XY):
        if XY % t == 0 and XY // t >= 2:
            best = t
        t += 128
    return best if best is not None else XY


def _pick_nw_chunk(NW, cap=256):
    """Chunk the NW contraction; returns a divisor of NW (NW itself if small)."""
    if NW <= cap:
        return NW
    best = NW
    t = 128
    while t <= cap:
        if NW % t == 0:
            best = t
        t += 128
    return best if best <= cap else NW


def matrixvt_project_pallas(depth_h, feat_t, circle_map, ray_map, *, txy=None):
    """depth_h: (B, NW, D) bf16, feat_t: (B, C, NW) bf16,
       circle_map: (B, D, XY) bf16, ray_map: (B, NW, XY) bf16 -> bev (B, C, XY) bf16."""
    B, NW, D = depth_h.shape
    C = feat_t.shape[1]
    XY = circle_map.shape[-1]
    if txy is None:
        txy = _pick_bev_tile(XY, NW, D, C)
    assert XY % txy == 0

    nw_chunk = _pick_nw_chunk(NW)
    n_chunks = NW // nw_chunk
    kernel = functools.partial(_matrixvt_proj_kernel,
                               nw_chunk=nw_chunk, n_chunks=n_chunks)

    # estimated double-buffered bf16 working set; raise scoped VMEM only if needed
    est = 2 * 2 * (NW * D + C * NW + D * txy + NW * txy + C * txy)
    vmem_limit = int(min(max(2 * est, 32 << 20), 56 << 20)) if est > (24 << 20) else None

    grid_spec = pltpu.PrefetchScalarGridSpec(
        num_scalar_prefetch=0,
        grid=(B, XY // txy),
        in_specs=[
            pl.BlockSpec((None, NW, D), lambda b, t: (b, 0, 0)),
            pl.BlockSpec((None, C, NW), lambda b, t: (b, 0, 0)),
            pl.BlockSpec((None, D, txy), lambda b, t: (b, 0, t)),
            pl.BlockSpec((None, NW, txy), lambda b, t: (b, 0, t)),
        ],
        out_specs=pl.BlockSpec((None, C, txy), lambda b, t: (b, 0, t)),
    )
    return pl.pallas_call(
        kernel,
        out_shape=jax.ShapeDtypeStruct((B, C, XY), jnp.bfloat16),
        grid_spec=grid_spec,
        compiler_params=pltpu.CompilerParams(
            dimension_semantics=("parallel", "parallel"),
            vmem_limit_bytes=vmem_limit),
    )(depth_h, feat_t, circle_map, ray_map)


# -----------------------------------------------------------------------------
# Module wrapper (mirrors BaseLSSFPN_matrixvt semantics in MatrixVT mode).
# -----------------------------------------------------------------------------
class BaseLSSFPNMatrixVT:
    def __init__(self, x_bound, y_bound, z_bound, d_bound, final_dim,
                 downsample_factor, output_channels, depth_net_conf,
                 mlp_in_dim=27, use_da=False, key=jax.random.PRNGKey(0)):
        self.downsample_factor = downsample_factor
        self.d_bound = d_bound
        self.final_dim = final_dim
        self.output_channels = output_channels
        self.use_da = use_da  # TODO(synk): depth_aggregation_net (3D conv) not ported.

        self.voxel_size = jnp.array([r[2] for r in (x_bound, y_bound, z_bound)],
                                    jnp.float32)
        self.voxel_coord = jnp.array([r[0] + r[2] / 2.0
                                      for r in (x_bound, y_bound, z_bound)], jnp.float32)
        self.voxel_num = jnp.array([(r[1] - r[0]) / r[2]
                                    for r in (x_bound, y_bound, z_bound)], jnp.int32)
        self._bev_x = int(round((x_bound[1] - x_bound[0]) / x_bound[2]))
        self._bev_y = int(round((y_bound[1] - y_bound[0]) / y_bound[2]))

        self.frustum = self.create_frustum()
        self.depth_channels = self.frustum.shape[0]

        cin = depth_net_conf["in_channels"]
        mid = depth_net_conf["mid_channels"]
        D = self.depth_channels
        cout = output_channels
        dc = D + cout
        dc_pad = max(128, _round_up(dc, 128))              # lane-dense fused head
        self._dc_pad = dc_pad

        ks = jax.random.split(key, 6)
        w_red = 0.1 * jax.random.normal(ks[0], (cin, mid), jnp.float32)
        w_d = 0.1 * jax.random.normal(ks[1], (mid, D), jnp.float32)
        w_c = 0.1 * jax.random.normal(ks[2], (mid, cout), jnp.float32)
        w_dc = jnp.zeros((mid, dc_pad), jnp.float32)
        w_dc = w_dc.at[:, :D].set(w_d).at[:, D:dc].set(w_c)
        self.params = {
            # bf16 MXU operands (f32 accumulate inside the kernels)
            "w_red": w_red.astype(jnp.bfloat16),
            "b_red": jnp.zeros((1, mid), jnp.float32),
            # fused, zero-padded depth/context head: one matmul, 128-aligned lanes
            "w_dc": w_dc.astype(jnp.bfloat16),
            "b_dc": jnp.zeros((1, dc_pad), jnp.float32),
            "w_mlp": 0.1 * jax.random.normal(ks[3], (mlp_in_dim, mid), jnp.float32),
            "b_mlp": jnp.zeros((mid,), jnp.float32),
        }

    def create_frustum(self):
        ogfH, ogfW = self.final_dim
        fH, fW = ogfH // self.downsample_factor, ogfW // self.downsample_factor
        d_coords = jnp.arange(self.d_bound[0], self.d_bound[1], self.d_bound[2],
                              dtype=jnp.float32).reshape(-1, 1, 1)
        D = d_coords.shape[0]
        d_coords = jnp.broadcast_to(d_coords, (D, fH, fW))
        x_coords = jnp.broadcast_to(
            jnp.linspace(0, ogfW - 1, fW, dtype=jnp.float32).reshape(1, 1, fW),
            (D, fH, fW))
        y_coords = jnp.broadcast_to(
            jnp.linspace(0, ogfH - 1, fH, dtype=jnp.float32).reshape(1, fH, 1),
            (D, fH, fW))
        paddings = jnp.ones_like(d_coords)
        return jnp.stack((x_coords, y_coords, d_coords, paddings), -1)

    def _forward_single_sweep(self, features_seconfpn, mlp_input, circle_map, ray_map,
                              batch_size, num_cams):
        BN, Cin, fH, fW = features_seconfpn.shape
        B, N = batch_size, num_cams
        D = self.depth_channels
        Cout = self.output_channels

        # NCHW -> per-camera channels-last pixel slab, bf16 matmul operands
        feat = jnp.transpose(features_seconfpn, (0, 2, 3, 1))
        feat = feat.reshape(B, N, fH * fW, Cin).astype(jnp.bfloat16)

        # SE-MLP on mlp_input (tiny, plain JAX), f32
        mlp_in = mlp_input.reshape(B * N, -1)
        se = jax.nn.sigmoid(mlp_in @ self.params["w_mlp"] + self.params["b_mlp"])
        se = se.reshape(B, N, 1, -1).astype(jnp.float32)

        # ---- Pallas kernel 1: depth net + softmax + height compression (fused) ----
        dh = depth_height_compress_pallas(
            feat, se, self.params["w_red"], self.params["b_red"],
            self.params["w_dc"], self.params["b_dc"],
            fH=fH, fW=fW, depth_channels=D)

        NW = N * fW
        depth_h = dh[..., :D].reshape(B, NW, D).astype(jnp.bfloat16)
        # (B, N, fW, Cout) -> (B, Cout, N*fW): tiny transpose in XLA so kernel 2
        # runs a clean (C, NW) @ (NW, txy) matmul with no in-kernel transposes.
        feat_t = jnp.transpose(dh[..., D:D + Cout], (0, 3, 1, 2)).reshape(B, Cout, NW)
        feat_t = feat_t.astype(jnp.bfloat16)

        # circle/ray are static precomputed maps: expect bf16 (cast once by caller);
        # fall back to a per-call cast only if they arrive in f32.
        if circle_map.dtype != jnp.bfloat16:
            circle_map = circle_map.astype(jnp.bfloat16)
        if ray_map.dtype != jnp.bfloat16:
            ray_map = ray_map.astype(jnp.bfloat16)

        # ---- Pallas kernel 2: ring & ray projection, lane-dense (C, XY) bf16 ----
        bev = matrixvt_project_pallas(depth_h, feat_t, circle_map, ray_map)
        # (B, C, XY) -> NCHW (B, C, X, Y): pure reshape, no transpose needed.
        return bev.reshape(B, Cout, self._bev_x, self._bev_y)

    def forward(self, sweep_imgs, features_seconfpn, sensor2ego_mats, intrin_mats,
                ida_mats, sensor2sensor_mats, bda_mat, mlp_input=None,
                circle_map=None, ray_map=None, timestamps=None, is_return_depth=False):
        batch_size, num_sweeps, num_cams = sweep_imgs.shape[:3]
        key_frame = self._forward_single_sweep(
            features_seconfpn, mlp_input, circle_map, ray_map, batch_size, num_cams)
        # TODO(synk): is_return_depth not supported — per-pixel depth is height-
        # compressed inside kernel 1 and never materialized.
        # TODO(synk): the original re-runs the image backbone per sweep; with the
        # backbone features reused here, 0.9*key + 0.1*sweep is exactly key_frame,
        # so the redundant second pass through both kernels is skipped.
        return key_frame


if __name__ == "__main__":
    key = jax.random.PRNGKey(0)
    ks = jax.random.split(key, 8)

    # small config consistent with the module
    x_bound = [-8.0, 8.0, 1.0]      # X = 16
    y_bound = [-8.0, 8.0, 1.0]      # Y = 16
    z_bound = [-2.0, 2.0, 4.0]
    d_bound = [2.0, 10.0, 0.5]      # D = 16 depth bins
    final_dim = (64, 128)
    downsample = 8                  # fH = 8, fW = 16
    out_channels = 16
    depth_net_conf = {"in_channels": 32, "mid_channels": 32}

    model = BaseLSSFPNMatrixVT(x_bound, y_bound, z_bound, d_bound, final_dim,
                               downsample, out_channels, depth_net_conf,
                               mlp_in_dim=27, key=ks[0])

    B, num_sweeps, N = 1, 1, 2
    fH, fW = final_dim[0] // downsample, final_dim[1] // downsample
    D = model.depth_channels
    X, Y = model._bev_x, model._bev_y
    XY = X * Y

    sweep_imgs = jax.random.normal(
        ks[1], (B, num_sweeps, N, 3, final_dim[0], final_dim[1]), jnp.float32)
    features = jax.random.normal(
        ks[2], (B * N, depth_net_conf["in_channels"], fH, fW), jnp.float32)
    eye = jnp.broadcast_to(jnp.eye(4, dtype=jnp.float32), (B, num_sweeps, N, 4, 4))
    sensor2ego_mats = eye
    intrin_mats = eye
    ida_mats = eye
    sensor2sensor_mats = eye
    bda_mat = jnp.broadcast_to(jnp.eye(4, dtype=jnp.float32), (B, 4, 4))
    mlp_input = jax.random.normal(ks[3], (B, N, 27), jnp.float32)
    # static MatrixVT maps: cast to bf16 ONCE at setup (not per forward call)
    circle_map = jax.nn.relu(
        jax.random.normal(ks[4], (B, D, XY), jnp.float32)).astype(jnp.bfloat16)
    ray_map = jax.nn.relu(
        jax.random.normal(ks[5], (B, N * fW, XY), jnp.float32)).astype(jnp.bfloat16)

    bev = model.forward(sweep_imgs, features, sensor2ego_mats, intrin_mats,
                        ida_mats, sensor2sensor_mats, bda_mat,
                        mlp_input=mlp_input, circle_map=circle_map, ray_map=ray_map)
    bev = jax.block_until_ready(bev)
    assert bev.shape == (B, out_channels, X, Y), bev.shape
    assert bool(jnp.all(jnp.isfinite(bev.astype(jnp.float32))))
    print("KERNEL_OK")
</pallas_src>

<mosaic_0001>
module attributes {stable_mosaic.version = 11 : i64} {
  func.func @_depth_height_kernel(%arg0: i32, %arg1: i32, %arg2: memref<1x1x128x32xbf16, #tpu.memory_space<vmem>>, %arg3: memref<1x1x1x32xf32, #tpu.memory_space<vmem>>, %arg4: memref<32x32xbf16, #tpu.memory_space<vmem>>, %arg5: memref<1x32xf32, #tpu.memory_space<vmem>>, %arg6: memref<32x128xbf16, #tpu.memory_space<vmem>>, %arg7: memref<1x128xf32, #tpu.memory_space<vmem>>, %arg8: memref<1x1x16x128xf32, #tpu.memory_space<vmem>>) attributes {dimension_semantics = [#tpu.dimension_semantics<parallel>, #tpu.dimension_semantics<parallel>], iteration_bounds = array<i64: 1, 2>, scalar_prefetch = 0 : i64, scratch_operands = 0 : i64, tpu.core_type = #tpu.core_type<tc>, window_params = [{transform_indices = @transform_0, window_bounds = array<i64: 1, 1, 128, 32>}, {transform_indices = @transform_1, window_bounds = array<i64: 1, 1, 1, 32>}, {pipeline_mode = #tpu.pipeline_mode<synchronous>, transform_indices = @transform_2, window_bounds = array<i64: 32, 32>}, {pipeline_mode = #tpu.pipeline_mode<synchronous>, transform_indices = @transform_3, window_bounds = array<i64: 1, 32>}, {pipeline_mode = #tpu.pipeline_mode<synchronous>, transform_indices = @transform_4, window_bounds = array<i64: 32, 128>}, {pipeline_mode = #tpu.pipeline_mode<synchronous>, transform_indices = @transform_5, window_bounds = array<i64: 1, 128>}, {transform_indices = @transform_6, window_bounds = array<i64: 1, 1, 16, 128>}]} {
    %c0 = arith.constant 0 : index
    %c0_0 = arith.constant 0 : index
    %c0_1 = arith.constant 0 : index
    %c0_2 = arith.constant 0 : index
    %0 = vector.load %arg2[%c0, %c0_0, %c0_1, %c0_2] : memref<1x1x128x32xbf16, #tpu.memory_space<vmem>>, vector<1x1x128x32xbf16>
    %1 = vector.shape_cast %0 : vector<1x1x128x32xbf16> to vector<128x32xbf16>
    %c0_3 = arith.constant 0 : index
    %c0_4 = arith.constant 0 : index
    %2 = vector.load %arg4[%c0_3, %c0_4] : memref<32x32xbf16, #tpu.memory_space<vmem>>, vector<32x32xbf16>
    %cst = arith.constant dense<0.000000e+00> : vector<128x32xf32>
    %3 = tpu.matmul %1, %2, %cst {dimension_numbers = #tpu.dot_dimension_numbers<[1], [0], [0], [1], [0, 0, 1, 1], [], []>} : vector<128x32xbf16>, vector<32x32xbf16>, vector<128x32xf32> -> vector<128x32xf32>
    %c0_5 = arith.constant 0 : index
    %c0_6 = arith.constant 0 : index
    %4 = vector.load %arg5[%c0_5, %c0_6] : memref<1x32xf32, #tpu.memory_space<vmem>>, vector<1x32xf32>
    %5 = vector.broadcast %4 : vector<1x32xf32> to vector<128x32xf32>
    %6 = arith.addf %3, %5 : vector<128x32xf32>
    %cst_7 = arith.constant 0.000000e+00 : f32
    %7 = vector.broadcast %cst_7 : f32 to vector<128x32xf32>
    %8 = arith.maximumf %6, %7 : vector<128x32xf32>
    %c0_8 = arith.constant 0 : index
    %c0_9 = arith.constant 0 : index
    %c0_10 = arith.constant 0 : index
    %c0_11 = arith.constant 0 : index
    %9 = vector.load %arg3[%c0_8, %c0_9, %c0_10, %c0_11] : memref<1x1x1x32xf32, #tpu.memory_space<vmem>>, vector<1x1x1x32xf32>
    %10 = vector.shape_cast %9 : vector<1x1x1x32xf32> to vector<1x32xf32>
    %11 = vector.broadcast %10 : vector<1x32xf32> to vector<128x32xf32>
    %12 = arith.mulf %8, %11 : vector<128x32xf32>
    %13 = arith.truncf %12 : vector<128x32xf32> to vector<128x32xbf16>
    %c0_12 = arith.constant 0 : index
    %c0_13 = arith.constant 0 : index
    %14 = vector.load %arg6[%c0_12, %c0_13] : memref<32x128xbf16, #tpu.memory_space<vmem>>, vector<32x128xbf16>
    %cst_14 = arith.constant dense<0.000000e+00> : vector<128x128xf32>
    %15 = tpu.matmul %13, %14, %cst_14 {dimension_numbers = #tpu.dot_dimension_numbers<[1], [0], [0], [1], [0, 0, 1, 1], [], []>} : vector<128x32xbf16>, vector<32x128xbf16>, vector<128x128xf32> -> vector<128x128xf32>
    %c0_15 = arith.constant 0 : index
    %c0_16 = arith.constant 0 : index
    %16 = vector.load %arg7[%c0_15, %c0_16] : memref<1x128xf32, #tpu.memory_space<vmem>>, vector<1x128xf32>
    %17 = vector.broadcast %16 : vector<1x128xf32> to vector<128x128xf32>
    %18 = arith.addf %15, %17 : vector<128x128xf32>
    %19 = tpu.iota {dimensions = array<i32: 1>} : vector<1x128xi32>
    %c16_i32 = arith.constant 16 : i32
    %20 = vector.broadcast %c16_i32 : i32 to vector<1x128xi32>
    %21 = arith.cmpi slt, %19, %20 : vector<1x128xi32>
    %cst_17 = arith.constant -1.000000e+30 : f32
    %22 = vector.shape_cast %21 : vector<1x128xi1> to vector<1x128xi1>
    %23 = vector.broadcast %22 : vector<1x128xi1> to vector<128x128xi1>
    %24 = vector.broadcast %cst_17 : f32 to vector<128x128xf32>
    %25 = arith.select %23, %18, %24 : vector<128x128xi1>, vector<128x128xf32>
    %cst_18 = arith.constant dense<0xFF800000> : vector<128xf32>
    %26 = vector.multi_reduction <maximumf>, %25, %cst_18 [1] : vector<128x128xf32> to vector<128xf32>
    %27 = vector.shape_cast %26 : vector<128xf32> to vector<128x1xf32>
    %28 = vector.broadcast %27 : vector<128x1xf32> to vector<128x128xf32>
    %29 = arith.subf %25, %28 : vector<128x128xf32>
    %30 = math.exp %29 : vector<128x128xf32>
    %cst_19 = arith.constant dense<0.000000e+00> : vector<128xf32>
    %31 = vector.multi_reduction <add>, %30, %cst_19 [1] : vector<128x128xf32> to vector<128xf32>
    %32 = vector.shape_cast %31 : vector<128xf32> to vector<128x1xf32>
    %33 = tpu.reciprocal %32 {approx = true} : vector<128x1xf32> -> vector<128x1xf32>
    %34 = vector.broadcast %33 : vector<128x1xf32> to vector<128x128xf32>
    %35 = arith.mulf %30, %34 : vector<128x128xf32>
    %cst_20 = arith.constant 0.000000e+00 : f32
    %36 = vector.broadcast %cst_20 : f32 to vector<16x128xf32>
    %cst_21 = arith.constant -1.000000e+30 : f32
    %37 = vector.broadcast %cst_21 : f32 to vector<16x128xf32>
    %38 = vector.extract_strided_slice %35 {offsets = [0, 0], sizes = [16, 128], strides = [1, 1]} : vector<128x128xf32> to vector<16x128xf32>
    %39 = arith.addf %36, %38 : vector<16x128xf32>
    %40 = vector.extract_strided_slice %18 {offsets = [0, 0], sizes = [16, 128], strides = [1, 1]} : vector<128x128xf32> to vector<16x128xf32>
    %41 = arith.maximumf %37, %40 : vector<16x128xf32>
    %42 = vector.extract_strided_slice %35 {offsets = [16, 0], sizes = [16, 128], strides = [1, 1]} : vector<128x128xf32> to vector<16x128xf32>
    %43 = arith.addf %39, %42 : vector<16x128xf32>
    %44 = vector.extract_strided_slice %18 {offsets = [16, 0], sizes = [16, 128], strides = [1, 1]} : vector<128x128xf32> to vector<16x128xf32>
    %45 = arith.maximumf %41, %44 : vector<16x128xf32>
    %46 = vector.extract_strided_slice %35 {offsets = [32, 0], sizes = [16, 128], strides = [1, 1]} : vector<128x128xf32> to vector<16x128xf32>
    %47 = arith.addf %43, %46 : vector<16x128xf32>
    %48 = vector.extract_strided_slice %18 {offsets = [32, 0], sizes = [16, 128], strides = [1, 1]} : vector<128x128xf32> to vector<16x128xf32>
    %49 = arith.maximumf %45, %48 : vector<16x128xf32>
    %50 = vector.extract_strided_slice %35 {offsets = [48, 0], sizes = [16, 128], strides = [1, 1]} : vector<128x128xf32> to vector<16x128xf32>
    %51 = arith.addf %47, %50 : vector<16x128xf32>
    %52 = vector.extract_strided_slice %18 {offsets = [48, 0], sizes = [16, 128], strides = [1, 1]} : vector<128x128xf32> to vector<16x128xf32>
    %53 = arith.maximumf %49, %52 : vector<16x128xf32>
    %54 = vector.extract_strided_slice %35 {offsets = [64, 0], sizes = [16, 128], strides = [1, 1]} : vector<128x128xf32> to vector<16x128xf32>
    %55 = arith.addf %51, %54 : vector<16x128xf32>
    %56 = vector.extract_strided_slice %18 {offsets = [64, 0], sizes = [16, 128], strides = [1, 1]} : vector<128x128xf32> to vector<16x128xf32>
    %57 = arith.maximumf %53, %56 : vector<16x128xf32>
    %58 = vector.extract_strided_slice %35 {offsets = [80, 0], sizes = [16, 128], strides = [1, 1]} : vector<128x128xf32> to vector<16x128xf32>
    %59 = arith.addf %55, %58 : vector<16x128xf32>
    %60 = vector.extract_strided_slice %18 {offsets = [80, 0], sizes = [16, 128], strides = [1, 1]} : vector<128x128xf32> to vector<16x128xf32>
    %61 = arith.maximumf %57, %60 : vector<16x128xf32>
    %62 = vector.extract_strided_slice %35 {offsets = [96, 0], sizes = [16, 128], strides = [1, 1]} : vector<128x128xf32> to vector<16x128xf32>
    %63 = arith.addf %59, %62 : vector<16x128xf32>
    %64 = vector.extract_strided_slice %18 {offsets = [96, 0], sizes = [16, 128], strides = [1, 1]} : vector<128x128xf32> to vector<16x128xf32>
    %65 = arith.maximumf %61, %64 : vector<16x128xf32>
    %66 = vector.extract_strided_slice %35 {offsets = [112, 0], sizes = [16, 128], strides = [1, 1]} : vector<128x128xf32> to vector<16x128xf32>
    %67 = arith.addf %63, %66 : vector<16x128xf32>
    %68 = vector.extract_strided_slice %18 {offsets = [112, 0], sizes = [16, 128], strides = [1, 1]} : vector<128x128xf32> to vector<16x128xf32>
    %69 = arith.maximumf %65, %68 : vector<16x128xf32>
    %cst_22 = arith.constant 1.250000e-01 : f32
    %70 = vector.broadcast %cst_22 : f32 to vector<16x128xf32>
    %71 = arith.mulf %67, %70 : vector<16x128xf32>
    %72 = vector.shape_cast %21 : vector<1x128xi1> to vector<1x128xi1>
    %73 = vector.broadcast %72 : vector<1x128xi1> to vector<16x128xi1>
    %74 = arith.select %73, %71, %69 : vector<16x128xi1>, vector<16x128xf32>
    %c0_23 = arith.constant 0 : index
    %c0_24 = arith.constant 0 : index
    %c0_25 = arith.constant 0 : index
    %c0_26 = arith.constant 0 : index
    %75 = vector.load %arg8[%c0_23, %c0_24, %c0_25, %c0_26] : memref<1x1x16x128xf32, #tpu.memory_space<vmem>>, vector<1x1x16x128xf32>
    %76 = vector.shape_cast %75 : vector<1x1x16x128xf32> to vector<16x128xf32>
    %77 = vector.shape_cast %74 : vector<16x128xf32> to vector<1x1x16x128xf32>
    tpu.vector_store %arg8[%c0_23, %c0_24, %c0_25, %c0_26], %77 {strides = array<i32>} : memref<1x1x16x128xf32, #tpu.memory_space<vmem>>, vector<1x1x16x128xf32>,
    return
  }
  func.func @transform_0(%arg0: i32, %arg1: i32) -> (i32, i32, i32, i32) {
    %c0_i32 = arith.constant 0 : i32
    %c0_i32_0 = arith.constant 0 : i32
    %c0_i32_1 = arith.constant 0 : i32
    return %arg0, %arg1, %c0_i32, %c0_i32_0 : i32, i32, i32, i32
  }
  func.func @transform_1(%arg0: i32, %arg1: i32) -> (i32, i32, i32, i32) {
    %c0_i32 = arith.constant 0 : i32
    %c0_i32_0 = arith.constant 0 : i32
    %c0_i32_1 = arith.constant 0 : i32
    return %arg0, %arg1, %c0_i32, %c0_i32_0 : i32, i32, i32, i32
  }
  func.func @transform_2(%arg0: i32, %arg1: i32) -> (i32, i32) {
    %c0_i32 = arith.constant 0 : i32
    %c0_i32_0 = arith.constant 0 : i32
    %c0_i32_1 = arith.constant 0 : i32
    return %c0_i32, %c0_i32_0 : i32, i32
  }
  func.func @transform_3(%arg0: i32, %arg1: i32) -> (i32, i32) {
    %c0_i32 = arith.constant 0 : i32
    %c0_i32_0 = arith.constant 0 : i32
    %c0_i32_1 = arith.constant 0 : i32
    return %c0_i32, %c0_i32_0 : i32, i32
  }
  func.func @transform_4(%arg0: i32, %arg1: i32) -> (i32, i32) {
    %c0_i32 = arith.constant 0 : i32
    %c0_i32_0 = arith.constant 0 : i32
    %c0_i32_1 = arith.constant 0 : i32
    return %c0_i32, %c0_i32_0 : i32, i32
  }
  func.func @transform_5(%arg0: i32, %arg1: i32) -> (i32, i32) {
    %c0_i32 = arith.constant 0 : i32
    %c0_i32_0 = arith.constant 0 : i32
    %c0_i32_1 = arith.constant 0 : i32
    return %c0_i32, %c0_i32_0 : i32, i32
  }
  func.func @transform_6(%arg0: i32, %arg1: i32) -> (i32, i32, i32, i32) {
    %c0_i32 = arith.constant 0 : i32
    %c0_i32_0 = arith.constant 0 : i32
    %c0_i32_1 = arith.constant 0 : i32
    return %arg0, %arg1, %c0_i32, %c0_i32_0 : i32, i32, i32, i32
  }
}

</mosaic_0001>

<bundles_post_ra>
// kernel: tpu_custom_call.1
= control target key start
LH: loop header
LB: loop body
LE: loop exit
PB: predicated region body
PF: predicated region fallthrough
CT: control target
= control target key end

     0   :  { %11 = vsyncpa [#allocation3], 0  ;;  %s1618_s0 = inlined_call_operand.vmem [shape: bf16[1,2,128,32], index: 0, kind: input, shape index: {}]   ;;  %s1619_s1 = inlined_call_operand.vmem [shape: f32[1,2,1,32], index: 1, kind: input, shape index: {}]   ;;  %s1620_s2 = inlined_call_operand.vmem [shape: bf16[32,32], index: 2, kind: input, shape index: {}]   ;;  %s1621_s3 = inlined_call_operand.vmem [shape: f32[1,32], index: 3, kind: input, shape index: {}]   ;;  %s1622_s4 = inlined_call_operand.vmem [shape: bf16[32,128], index: 4, kind: input, shape index: {}]   ;;  %s1623_s5 = inlined_call_operand.vmem [shape: f32[1,128], index: 5, kind: input, shape index: {}]   ;;  %s1624_s6 = inlined_call_operand.hbm [shape: f32[1,2,16,128], index: 6, kind: output, shape index: {}]  }
   0x1   :  { %13 = vsyncpa [#allocation3 + $0x1], 0  ;;  %s1248_s21 = smov 0   ;;  %s1250_s22 = smov 0  }
   0x2   :  { %s1252_s23 = smov 0   ;;  %s1254_s24 = smov 0  }
   0x3   :  { %s1256_s25 = smov 0   ;;  %s1258_s26 = smov 0  }
   0x4 LB: > { %s912_s27 = sadd.s32 4294967295, %s1209_s26   ;;  %s913_s28 = sadd.s32 4294967294, %s1209_s26   ;;  %s1209_s26 = sphi %s1258_s26, %s19_s26   ;;  %s1205_s25 = sphi %s1256_s25, %s1631_s25   ;;  %s1201_s24 = sphi %s1254_s24, %s1630_s24   ;;  %s1197_s23 = sphi %s1252_s23, %s1629_s23   ;;  %s1193_s22 = sphi %s1250_s22, %s1628_s22   ;;  %s1189_s21 = sphi %s1248_s21, %s1627_s21  }
   0x5   : > { %s28_s29 = sadd.s32 1, %s1205_s25  ;;  %s180_s30 = sadd.s32 1, %s1197_s23 }
   0x6   : > { %p29_p0 = scmp.ge.s32.totalorder %s28_s29, 2  ;;  %p190_p1 = scmp.ne.s32.totalorder %s1197_s23, %s1193_s22 }
   0x7   : > { %p191_p2 = scmp.eq.s32.totalorder %s912_s27, 1  ;;  %p196_p3 = scmp.ne.s32.totalorder %s1193_s22, %s1189_s21 }
   0x8   : > { %s1633_s29 = smov (%p29_p0, %s28_s29), 0  ;;  %p197_p5 = scmp.eq.s32.totalorder %s913_s28, 1 }
   0x9   : > { %p1288_p4 = por %p191_p2, %p190_p1  ;;  %s176_s8 = ssub.s32 %s1205_s25, %s1633_s29 }
   0xa   : > { %p916_p6 = scmp.ge.s32.totalorder %s1209_s26, 1  ;;  %p178_p7 = scmp.eq.s32.totalorder %s176_s8, 0 }
   0xb   : > { %p1295_p8 = por %p197_p5, %p196_p3  ;;  %p249_p9 = scmp.lt.s32.totalorder %s1209_s26, 3 }
   0xc   : > { %s1301_s10 = scalar_select %p178_p7, %s1197_s23, %s180_s30  }
   0xd   : > { %p250_p10 = pnand %p916_p6, %p249_p9 }
   0xe   : > { %p292_p11 = scmp.lt.s32.totalorder (!%p250_p10), %s1201_s24, 1  ;;  %s1002_s27 = sshll.u32 (!%p250_p10), %s1201_s24, 4 }
   0xf   : > { %253 = sbr.rel (%p250_p10) target bundleno = 628 (0x274), region = 44  ;;  %s811_s8 = scalar_lea.hbm (!%p250_p10), %s1624_s6, %s1002_s27 }
  0x10   : > { %s814_s12 = sshll.u32 (!%p250_p10), %s811_s8, 4  ;;  %s1151_s18 = scalar_lea.hbm (!%p250_p10), %s1624_s6, 32  ;;  %s815_s12 = int_to_ptr.hbm [resolvable:$true] %s814_s12 }
  0x11   : > { %s1145_s14 = sshra.s32 (!%p250_p10), %s815_s12, 4  ;;  %s1146_s14 = int_to_ptr.hbm [resolvable:$true] %s1145_s14 }
  0x12   : > { %p1152_p1 = scmp.lt.s32.totalorder (!%p250_p10), %s1146_s14, %s1624_s6 }
  0x14   : > { %v999_v0 = vld [vmem:[%s1620_s2 + $0x8] sm:$0xff]  ;;  %v998_v1 = vld [vmem:[%s1620_s2] sm:$0xff]  ;;  %s1311_s15 = scalar_select %p292_p11, %s1201_s24, 1  ;;  %vm383_vm0 = vcmask 261120  }
  0x15   : > { %414 = vmatpush.bf16.msra.mxu0 %v999_v0  ;;  %1003 = vmatpush.bf16.msra.mxu2 %v999_v0  ;;  %v1001_v10 = vld [vmem:[%s1622_s4 + $0x8] sm:$0xff]  ;;  %v1000_v11 = vld [vmem:[%s1622_s4] sm:$0xff] }
  0x16   : > { %s989_s16 = sshll.u32 %s1311_s15, 6  ;;  %s305_s19 = scalar_lea.vmem %s1619_s1, %s1311_s15  ;;  %551 = vmatpush.bf16.msra.mxu1 %v1001_v10  ;;  %1005 = vmatpush.bf16.msra.mxu3 %v1001_v10  ;;  %v1338_v13 = vld [vmem:[%s1621_s3] ss:$0 sm:$0xff] }
  0x17   : > { %s298_s28 = scalar_lea.vmem %s1618_s0, %s989_s16  ;;  %v1346_v17 = vld [vmem:[%s305_s19] ss:$0 sm:$0xff]  ;;  %s287_s19 = sand.u32 1, %s1193_s22  }
  0x18   : > { %v990_v2 = vld [vmem:[%s298_s28] sm:$0xff]  ;;  %v991_v4 = vld [vmem:[%s298_s28 + $0x8] sm:$0xff]  ;;  %v992_v6 = vld [vmem:[%s298_s28 + $0x10] sm:$0xff]  ;;  %s917_s20 = sshll.u32 %s287_s19, 4  ;;  %s798_s13 = scalar_lea.sflag [#allocation3], %s287_s19 }
  0x19   : > { %415 = vmatpush.bf16.msra.mxu0 %v998_v1  ;;  %1004 = vmatpush.bf16.msra.mxu2 %v998_v1  ;;  %v994_v3 = vld [vmem:[%s298_s28 + $0x20] sm:$0xff]  ;;  %v995_v5 = vld [vmem:[%s298_s28 + $0x28] sm:$0xff]  ;;  %v996_v7 = vld [vmem:[%s298_s28 + $0x30] sm:$0xff]  ;;  %s289_s11 = scalar_lea.vmem [#allocation2], %s917_s20  ;;  %s1147_s16 = scalar_lea.hbm %s1146_s14, 16 }
  0x1a   : > { %v993_v8 = vld [vmem:[%s298_s28 + $0x18] sm:$0xff]  ;;  %552 = vmatpush.bf16.msra.mxu1 %v1000_v11  ;;  %1006 = vmatpush.bf16.msra.mxu3 %v1000_v11  ;;  %s812_s24 = sshll.u32 %s289_s11, 4  ;;  %p1148_p12 = scmp.ne.s32.totalorder %s1146_s14, %s1147_s16  ;;  %s813_s24 = int_to_ptr.vmem [resolvable:$true] %s812_s24 }
  0x1b   : > { %v997_v9 = vld [vmem:[%s298_s28 + $0x38] sm:$0xff]  ;;  %p1153_p2 = scmp.lt.s32.totalorder %s1151_s18, %s1147_s16 }
  0x1c   : > { %960 = vmatmul.msk.bf16.vlgmr.msra.gmra.mxu0 %vm383_vm0, %v990_v2  ;;  %964 = vmatmul.msk.bf16.vlgmr.msra.gmra.mxu2 %vm383_vm0, %v994_v3  ;;  %p1149_p13 = pnand %p1148_p12, %p1288_p4 }
  0x1d   : > { %p1154_p3 = por %p1153_p2, %p1152_p1 }
  0x1e   : > { %p1150_p0 = pneg %p1149_p13 }
  0x20   : > { %p1155_p5 = pnand %p1154_p3, %p1150_p0 }
  0x2c   : > { %961 = vmatmul.msk.bf16.gmra.mxu0 %vm383_vm0, %v991_v4  ;;  %965 = vmatmul.msk.bf16.gmra.mxu2 %vm383_vm0, %v995_v5 }
  0x3c   : > { %962 = vmatmul.msk.bf16.gmra.mxu0 %vm383_vm0, %v992_v6  ;;  %966 = vmatmul.msk.bf16.gmra.mxu2 %vm383_vm0, %v996_v7 }
  0x4c   : > { %963 = vmatmul.msk.bf16.gmra.mxu0 %vm383_vm0, %v993_v8  ;;  %967 = vmatmul.msk.bf16.gmra.mxu2 %vm383_vm0, %v997_v9 }
  0x99   : > { %v417_v12 = vpop.f32.mrf.mxu0 }
  0x9a   : > { %v418_v14 = vadd.f32 %v1338_v13, %v417_v12 }
  0x9c   : > { %v457_v18 = vmax.f32 %v418_v14, 0.0 }
  0x9e   : > { %v477_v22 = vmul.f32 %v1346_v17, %v457_v18 }
  0x9f   : > { %v437_v15 = vpop.f32.mrf.mxu2 }
  0xa0   : > { %v438_v20 = vadd.f32 %v1338_v13, %v437_v15 }
  0xa1   : > { %v419_v16 = vpop.f32.mrf.mxu0 }
  0xa2   : > { %v420_v19 = vadd.f32 %v1338_v13, %v419_v16  ;;  %v465_v25 = vmax.f32 %v438_v20, 0.0 }
  0xa4   : > { %v458_v21 = vmax.f32 %v420_v19, 0.0  ;;  %v485_v30 = vmul.f32 %v1346_v17, %v465_v25 }
  0xa6   : > { %v478_v23 = vmul.f32 %v1346_v17, %v458_v21 }
  0xa7   : > { %v439_v24 = vpop.f32.mrf.mxu2 }
  0xa8   : > { %v440_v26 = vadd.f32 %v1338_v13, %v439_v24  ;;  %v493_v27 = vpack.c.bf16 %v478_v23, %v477_v22  ;;  %v594_v24 = vlaneseq }
  0xa9   : > { %v422_v28 = vpop.f32.mrf.mxu0 }
  0xaa   : > { %v466_v29 = vmax.f32 %v440_v26, 0.0  ;;  %976 = vmatmul.msk.bf16.vlgmr.msra.gmra.mxu1 %vm383_vm0, %v493_v27  ;;  %v423_v32 = vadd.f32 %v1338_v13, %v422_v28  ;;  %v1387_v25 = vand.u32 127, %v594_v24  ;;  %v1392_v26 = vld [vmem:[%s1623_s5] ss:$0 sm:$0xff] }
  0xac   : > { %v486_v31 = vmul.f32 %v1346_v17, %v466_v29  ;;  %v459_v36 = vmax.f32 %v423_v32, 0.0  ;;  %vm596_vm1 = vcmp.lt.s32.totalorder %v1387_v25, 16 }
  0xae   : > { %v497_v33 = vpack.c.bf16 %v486_v31, %v485_v30  ;;  %v479_v40 = vmul.f32 %v1346_v17, %v459_v36 }
  0xaf   : > { %v442_v34 = vpop.f32.mrf.mxu2 }
  0xb0   : > { %980 = vmatmul.msk.bf16.vlgmr.msra.gmra.mxu3 %vm383_vm0, %v497_v33  ;;  %v443_v38 = vadd.f32 %v1338_v13, %v442_v34 }
  0xb1   : > { %v424_v35 = vpop.f32.mrf.mxu0 }
  0xb2   : > { %v425_v37 = vadd.f32 %v1338_v13, %v424_v35  ;;  %v467_v43 = vmax.f32 %v443_v38, 0.0 }
  0xb4   : > { %v460_v39 = vmax.f32 %v425_v37, 0.0  ;;  %v487_v48 = vmul.f32 %v1346_v17, %v467_v43 }
  0xb6   : > { %v480_v41 = vmul.f32 %v1346_v17, %v460_v39 }
  0xb7   : > { %v444_v42 = vpop.f32.mrf.mxu2 }
  0xb8   : > { %v445_v44 = vadd.f32 %v1338_v13, %v444_v42  ;;  %v494_v45 = vpack.c.bf16 %v480_v41, %v479_v40 }
  0xb9   : > { %v427_v46 = vpop.f32.mrf.mxu0 }
  0xba   : > { %v468_v47 = vmax.f32 %v445_v44, 0.0  ;;  %977 = vmatmul.msk.bf16.gmra.mxu1 %vm383_vm0, %v494_v45  ;;  %v428_v50 = vadd.f32 %v1338_v13, %v427_v46 }
  0xbc   : > { %v488_v49 = vmul.f32 %v1346_v17, %v468_v47  ;;  %v461_v54 = vmax.f32 %v428_v50, 0.0 }
  0xbe   : > { %v498_v51 = vpack.c.bf16 %v488_v49, %v487_v48  ;;  %v481_v58 = vmul.f32 %v1346_v17, %v461_v54 }
  0xbf   : > { %v447_v52 = vpop.f32.mrf.mxu2 }
  0xc0   : > { %981 = vmatmul.msk.bf16.gmra.mxu3 %vm383_vm0, %v498_v51  ;;  %v448_v56 = vadd.f32 %v1338_v13, %v447_v52 }
  0xc1   : > { %v429_v53 = vpop.f32.mrf.mxu0 }
  0xc2   : > { %v430_v55 = vadd.f32 %v1338_v13, %v429_v53  ;;  %v469_v61 = vmax.f32 %v448_v56, 0.0 }
  0xc4   : > { %v462_v57 = vmax.f32 %v430_v55, 0.0  ;;  %v489_v2 = vmul.f32 %v1346_v17, %v469_v61 }
  0xc6   : > { %v482_v59 = vmul.f32 %v1346_v17, %v462_v57 }
  0xc7   : > { %v449_v60 = vpop.f32.mrf.mxu2 }
  0xc8   : > { %v450_v62 = vadd.f32 %v1338_v13, %v449_v60  ;;  %v495_v63 = vpack.c.bf16 %v482_v59, %v481_v58 }
  0xc9   : > { %v432_v0 = vpop.f32.mrf.mxu0 }
  0xca   : > { %v470_v1 = vmax.f32 %v450_v62, 0.0  ;;  %978 = vmatmul.msk.bf16.gmra.mxu1 %vm383_vm0, %v495_v63  ;;  %v433_v4 = vadd.f32 %v1338_v13, %v432_v0 }
  0xcc   : > { %v490_v3 = vmul.f32 %v1346_v17, %v470_v1  ;;  %v463_v8 = vmax.f32 %v433_v4, 0.0 }
  0xce   : > { %v499_v5 = vpack.c.bf16 %v490_v3, %v489_v2  ;;  %v483_v12 = vmul.f32 %v1346_v17, %v463_v8 }
  0xcf   : > { %v452_v6 = vpop.f32.mrf.mxu2 }
  0xd0   : > { %982 = vmatmul.msk.bf16.gmra.mxu3 %vm383_vm0, %v499_v5  ;;  %v453_v10 = vadd.f32 %v1338_v13, %v452_v6 }
  0xd1   : > { %v434_v7 = vpop.f32.mrf.mxu0 }
  0xd2   : > { %v435_v9 = vadd.f32 %v1338_v13, %v434_v7  ;;  %v471_v16 = vmax.f32 %v453_v10, 0.0 }
  0xd4   : > { %v464_v11 = vmax.f32 %v435_v9, 0.0  ;;  %v491_v21 = vmul.f32 %v1346_v17, %v471_v16 }
  0xd6   : > { %v484_v14 = vmul.f32 %v1346_v17, %v464_v11 }
  0xd7   : > { %v454_v15 = vpop.f32.mrf.mxu2 }
  0xd8   : > { %v455_v18 = vadd.f32 %v1338_v13, %v454_v15  ;;  %v496_v19 = vpack.c.bf16 %v484_v14, %v483_v12 }
  0xda   : > { %v472_v20 = vmax.f32 %v455_v18, 0.0  ;;  %979 = vmatmul.msk.bf16.gmra.mxu1 %vm383_vm0, %v496_v19 }
  0xdc   : > { %v492_v22 = vmul.f32 %v1346_v17, %v472_v20 }
  0xde   : > { %v500_v23 = vpack.c.bf16 %v492_v22, %v491_v21 }
  0xe0   : > { %983 = vmatmul.msk.bf16.gmra.mxu3 %vm383_vm0, %v500_v23 }
 0x127   : > { %v554_v13 = vpop.f32.mrf.mxu1 }
 0x128   : > { %v555_v27 = vadd.f32 %v1392_v26, %v554_v13 }
 0x12a   : > { %v1398_v28 = vsel %vm596_vm1, %v555_v27, -1e+30  ;;  %v761_v35 = vmax.f32 %v555_v27, -1e+30 }
 0x12b   : > { %615 = vmax.xlane.f32.xlu0 %v1398_v28 }
 0x12f   : > { %v556_v17 = vpop.f32.mrf.mxu1 }
 0x130   : > { %v557_v29 = vadd.f32 %v1392_v26, %v556_v17 }
 0x132   : > { %v1404_v30 = vsel %vm596_vm1, %v557_v29, -1e+30  ;;  %v762_v43 = vmax.f32 %v557_v29, -1e+30 }
 0x133   : > { %v574_v31 = vpop.f32.mrf.mxu3  ;;  %617 = vmax.xlane.f32.xlu0 %v1404_v30 }
 0x134   : > { %v575_v32 = vadd.f32 %v1392_v26, %v574_v31 }
 0x136   : > { %v1410_v33 = vsel %vm596_vm1, %v575_v32, -1e+30 }
 0x137   : > { %631 = vmax.xlane.f32.xlu2 %v1410_v33  ;;  %v559_v34 = vpop.f32.mrf.mxu1 }
 0x138   : > { %v560_v36 = vadd.f32 %v1392_v26, %v559_v34 }
 0x13a   : > { %v765_v37 = vmax.f32 %v761_v35, %v560_v36  ;;  %v1416_v38 = vsel %vm596_vm1, %v560_v36, -1e+30 }
 0x13b   : > { %v576_v39 = vpop.f32.mrf.mxu3  ;;  %619 = vmax.xlane.f32.xlu1 %v1416_v38 }
 0x13c   : > { %v577_v40 = vadd.f32 %v1392_v26, %v576_v39 }
 0x13e   : > { %v1422_v41 = vsel %vm596_vm1, %v577_v40, -1e+30 }
 0x13f   : > { %v561_v42 = vpop.f32.mrf.mxu1  ;;  %633 = vmax.xlane.f32.xlu0 %v1422_v41 }
 0x140   : > { %v562_v44 = vadd.f32 %v1392_v26, %v561_v42 }
 0x142   : > { %v766_v45 = vmax.f32 %v762_v43, %v562_v44  ;;  %v1428_v46 = vsel %vm596_vm1, %v562_v44, -1e+30 }
 0x143   : > { %v579_v47 = vpop.f32.mrf.mxu3  ;;  %621 = vmax.xlane.f32.xlu1 %v1428_v46 }
 0x144   : > { %v580_v48 = vadd.f32 %v1392_v26, %v579_v47 }
 0x146   : > { %v1439_v53 = vsel %vm596_vm1, %v580_v48, -1e+30 }
 0x147   : > { %v564_v49 = vpop.f32.mrf.mxu1 }
 0x148   : > { %v565_v50 = vadd.f32 %v1392_v26, %v564_v49 }
 0x14a   : > { %v769_v51 = vmax.f32 %v765_v37, %v565_v50  ;;  %v1435_v52 = vsel %vm596_vm1, %v565_v50, -1e+30 }
 0x14b   : > { %v581_v54 = vpop.f32.mrf.mxu3  ;;  %623 = vmax.xlane.f32.xlu2 %v1435_v52  ;;  %635 = vmax.xlane.f32.xlu1 %v1439_v53 }
 0x14c   : > { %v582_v61 = vadd.f32 %v1392_v26, %v581_v54 }
 0x14e   : > { %v1459_v2 = vsel %vm596_vm1, %v582_v61, -1e+30 }
 0x14f   : > { %v566_v55 = vpop.f32.mrf.mxu1 }
 0x150   : > { %v567_v56 = vadd.f32 %v1392_v26, %v566_v55 }
 0x152   : > { %v770_v57 = vmax.f32 %v766_v45, %v567_v56  ;;  %v1446_v58 = vsel %vm596_vm1, %v567_v56, -1e+30 }
 0x153   : > { %v584_v59 = vpop.f32.mrf.mxu3  ;;  %625 = vmax.xlane.f32.xlu2 %v1446_v58 }
 0x154   : > { %v585_v60 = vadd.f32 %v1392_v26, %v584_v59 }
 0x156   : > { %v1453_v62 = vsel %vm596_vm1, %v585_v60, -1e+30 }
 0x157   : > { %v569_v63 = vpop.f32.mrf.mxu1  ;;  %639 = vmax.xlane.f32.xlu0 %v1453_v62 }
 0x158   : > { %v570_v0 = vadd.f32 %v1392_v26, %v569_v63 }
 0x15a   : > { %v773_v1 = vmax.f32 %v769_v51, %v570_v0  ;;  %v1464_v5 = vsel %vm596_vm1, %v570_v0, -1e+30 }
 0x15b   : > { %v586_v3 = vpop.f32.mrf.mxu3  ;;  %637 = vmax.xlane.f32.xlu2 %v1459_v2 }
 0x15c   : > { %v777_v4 = vmax.f32 %v773_v1, %v575_v32  ;;  %v587_v16 = vadd.f32 %v1392_v26, %v586_v3 }
 0x15e   : > { %v781_v6 = vmax.f32 %v777_v4, %v580_v48  ;;  %v1484_v22 = vsel %vm596_vm1, %v587_v16, -1e+30 }
 0x15f   : > { %v571_v7 = vpop.f32.mrf.mxu1  ;;  %627 = vmax.xlane.f32.xlu0 %v1464_v5 }
 0x160   : > { %v572_v8 = vadd.f32 %v1392_v26, %v571_v7  ;;  %v785_v9 = vmax.f32 %v781_v6, %v585_v60 }
 0x162   : > { %v774_v10 = vmax.f32 %v770_v57, %v572_v8  ;;  %v1470_v11 = vsel %vm596_vm1, %v572_v8, -1e+30 }
 0x163   : > { %v589_v12 = vpop.f32.mrf.mxu3  ;;  %629 = vmax.xlane.f32.xlu1 %v1470_v11 }
 0x164   : > { %v778_v14 = vmax.f32 %v774_v10, %v577_v40  ;;  %v590_v15 = vadd.f32 %v1392_v26, %v589_v12 }
 0x166   : > { %v1475_v18 = vmax.f32 %v785_v9, %v590_v15  ;;  %v1479_v19 = vsel %vm596_vm1, %v590_v15, -1e+30  ;;  %v782_v20 = vmax.f32 %v778_v14, %v582_v61 }
 0x167   : > { %643 = vmax.xlane.f32.xlu2 %v1479_v19 }
 0x168   : > { %v786_v21 = vmax.f32 %v782_v20, %v587_v16 }
 0x16b   : > { %v591_v23 = vpop.f32.mrf.mxu3  ;;  %641 = vmax.xlane.f32.xlu1 %v1484_v22 }
 0x16c   : > { %v592_v24 = vadd.f32 %v1392_v26, %v591_v23 }
 0x16e   : > { %v1488_v13 = vmax.f32 %v786_v21, %v592_v24  ;;  %v1492_v27 = vsel %vm596_vm1, %v592_v24, -1e+30 }
 0x16f   : > { %645 = vmax.xlane.f32.xlu0 %v1492_v27 }
 0x19e   : > { %v616_v17 = vpop.xlane.xlu0 %615 }
 0x19f   : > { %v647_v29 = vsub.f32 %v1398_v28, %v616_v17 }
 0x1a1   : > { %v663_v31 = vmul.f32 1.442695, %v647_v29 }
 0x1a3   : > { %1067 = vpow2.f32 %v663_v31 }
 0x1a6   : > { %v618_v32 = vpop.xlane.xlu0 %617 }
 0x1a7   : > { %v648_v34 = vsub.f32 %v1404_v30, %v618_v32 }
 0x1a9   : > { %v1497_v35 = vpop.eup %1067  ;;  %v665_v36 = vmul.f32 1.442695, %v648_v34 }
 0x1aa   : > { %v632_v26 = vpop.xlane.xlu2 %631  ;;  %695 = vadd.xlane.f32.xlu1 %v1497_v35 }
 0x1ab   : > { %1069 = vpow2.f32 %v665_v36  ;;  %v655_v37 = vsub.f32 %v1410_v33, %v632_v26 }
 0x1ad   : > { %v679_v39 = vmul.f32 1.442695, %v655_v37 }
 0x1ae   : > { %v620_v40 = vpop.xlane.xlu1 %619 }
 0x1af   : > { %1071 = vpow2.f32 %v679_v39  ;;  %v649_v42 = vsub.f32 %v1416_v38, %v620_v40 }
 0x1b1   : > { %v1502_v28 = vpop.eup %1069  ;;  %v667_v43 = vmul.f32 1.442695, %v649_v42 }
 0x1b2   : > { %697 = vadd.xlane.f32.xlu2 %v1502_v28  ;;  %v634_v30 = vpop.xlane.xlu0 %633 }
 0x1b3   : > { %v656_v44 = vsub.f32 %v1422_v41, %v634_v30  ;;  %1073 = vpow2.f32 %v667_v43 }
 0x1b5   : > { %v1506_v45 = vpop.eup %1071  ;;  %v681_v47 = vmul.f32 1.442695, %v656_v44 }
 0x1b6   : > { %v622_v48 = vpop.xlane.xlu1 %621  ;;  %711 = vadd.xlane.f32.xlu0 %v1506_v45 }
 0x1b7   : > { %1075 = vpow2.f32 %v681_v47  ;;  %v650_v33 = vsub.f32 %v1428_v46, %v622_v48 }
 0x1b9   : > { %v669_v49 = vmul.f32 1.442695, %v650_v33  ;;  %v1510_v38 = vpop.eup %1073 }
 0x1bb   : > { %1077 = vpow2.f32 %v669_v49 }
 0x1bd   : > { %v1512_v50 = vpop.eup %1075 }
 0x1be   : > { %v624_v51 = vpop.xlane.xlu2 %623  ;;  %v636_v54 = vpop.xlane.xlu1 %635  ;;  %699 = vadd.xlane.f32.xlu0 %v1510_v38  ;;  %713 = vadd.xlane.f32.xlu1 %v1512_v50 }
 0x1bf   : > { %v657_v41 = vsub.f32 %v1439_v53, %v636_v54  ;;  %v651_v56 = vsub.f32 %v1435_v52, %v624_v51 }
 0x1c1   : > { %v683_v55 = vmul.f32 1.442695, %v657_v41  ;;  %v1518_v57 = vpop.eup %1077  ;;  %v671_v60 = vmul.f32 1.442695, %v651_v56 }
 0x1c3   : > { %1079 = vpow2.f32 %v683_v55 }
 0x1c6   : > { %v626_v46 = vpop.xlane.xlu2 %625  ;;  %701 = vadd.xlane.f32.xlu1 %v1518_v57 }
 0x1c7   : > { %v652_v59 = vsub.f32 %v1446_v58, %v626_v46 }
 0x1c9   : > { %v673_v61 = vmul.f32 1.442695, %v652_v59  ;;  %v1522_v63 = vpop.eup %1079 }
 0x1ca   : > { %v640_v0 = vpop.xlane.xlu0 %639  ;;  %715 = vadd.xlane.f32.xlu2 %v1522_v63 }
 0x1cb   : > { %1081 = vpow2.f32 %v673_v61  ;;  %v659_v53 = vsub.f32 %v1453_v62, %v640_v0 }
 0x1cc   : > { %1083 = vpow2.f32 %v671_v60 }
 0x1cd   : > { %v687_v52 = vmul.f32 1.442695, %v659_v53 }
 0x1ce   : > { %v638_v1 = vpop.xlane.xlu2 %637 }
 0x1cf   : > { %1085 = vpow2.f32 %v687_v52  ;;  %v658_v3 = vsub.f32 %v1459_v2, %v638_v1 }
 0x1d1   : > { %v1527_v4 = vpop.eup %1081  ;;  %v685_v6 = vmul.f32 1.442695, %v658_v3 }
 0x1d2   : > { %v1529_v58 = vpop.eup %1083  ;;  %705 = vadd.xlane.f32.xlu0 %v1527_v4  ;;  %v628_v7 = vpop.xlane.xlu0 %627 }
 0x1d3   : > { %1087 = vpow2.f32 %v685_v6  ;;  %703 = vadd.xlane.f32.xlu2 %v1529_v58  ;;  %v653_v8 = vsub.f32 %v1464_v5, %v628_v7 }
 0x1d5   : > { %v1534_v62 = vpop.eup %1085  ;;  %v675_v9 = vmul.f32 1.442695, %v653_v8 }
 0x1d6   : > { %v630_v10 = vpop.xlane.xlu1 %629  ;;  %719 = vadd.xlane.f32.xlu1 %v1534_v62 }
 0x1d7   : > { %1089 = vpow2.f32 %v675_v9  ;;  %v654_v2 = vsub.f32 %v1470_v11, %v630_v10 }
 0x1d9   : > { %v1538_v12 = vpop.eup %1087  ;;  %v677_v14 = vmul.f32 1.442695, %v654_v2 }
 0x1da   : > { %v644_v15 = vpop.xlane.xlu2 %643  ;;  %717 = vadd.xlane.f32.xlu0 %v1538_v12 }
 0x1db   : > { %1091 = vpow2.f32 %v677_v14  ;;  %v661_v16 = vsub.f32 %v1479_v19, %v644_v15 }
 0x1dd   : > { %v1090_v20 = vpop.eup %1089  ;;  %v691_v5 = vmul.f32 1.442695, %v661_v16 }
 0x1de   : > { %v642_v21 = vpop.xlane.xlu1 %641  ;;  %707 = vadd.xlane.f32.xlu1 %v1090_v20 }
 0x1df   : > { %1093 = vpow2.f32 %v691_v5  ;;  %v660_v23 = vsub.f32 %v1484_v22, %v642_v21 }
 0x1e1   : > { %v1543_v24 = vpop.eup %1091  ;;  %v689_v17 = vmul.f32 1.442695, %v660_v23 }
 0x1e2   : > { %709 = vadd.xlane.f32.xlu2 %v1543_v24  ;;  %v646_v11 = vpop.xlane.xlu0 %645 }
 0x1e3   : > { %1095 = vpow2.f32 %v689_v17  ;;  %v662_v29 = vsub.f32 %v1492_v27, %v646_v11 }
 0x1e5   : > { %v1547_v31 = vpop.eup %1093  ;;  %v693_v32 = vmul.f32 1.442695, %v662_v29 }
 0x1e6   : > { %723 = vadd.xlane.f32.xlu0 %v1547_v31 }
 0x1e7   : > { %1097 = vpow2.f32 %v693_v32 }
 0x1e9   : > { %v1550_v19 = vpop.eup %1095 }
 0x1ea   : > { %721 = vadd.xlane.f32.xlu2 %v1550_v19 }
 0x1ed   : > { %v1553_v22 = vpop.eup %1097 }
 0x1ee   : > { %725 = vadd.xlane.f32.xlu1 %v1553_v22 }
 0x21d   : > { %v696_v34 = vpop.xlane.xlu1 %695 }
 0x225   : > { %v698_v26 = vpop.xlane.xlu2 %697 }
 0x229   : > { %v712_v36 = vpop.xlane.xlu0 %711 }
 0x231   : > { %v714_v37 = vpop.xlane.xlu1 %713  ;;  %v700_v39 = vpop.xlane.xlu0 %699 }
 0x232   : > { %1099 = vrcp.f32 %v700_v39 }
 0x233   : > { %1101 = vrcp.f32 %v696_v34 }
 0x238   : > { %v1100_v44 = vpop.eup %1099 }
 0x239   : > { %v702_v40 = vpop.xlane.xlu1 %701  ;;  %v1102_v47 = vpop.eup %1101  ;;  %v745_v51 = vmul.f32 %v1100_v44, %v1510_v38 }
 0x23a   : > { %v743_v55 = vmul.f32 %v1102_v47, %v1497_v35 }
 0x23c   : > { %v763_v61 = vadd.f32 %v745_v51, %v743_v55 }
 0x23d   : > { %v716_v27 = vpop.xlane.xlu2 %715 }
 0x245   : > { %v706_v42 = vpop.xlane.xlu0 %705 }
 0x246   : > { %v704_v43 = vpop.xlane.xlu2 %703 }
 0x247   : > { %1103 = vrcp.f32 %v704_v43 }
 0x248   : > { %1105 = vrcp.f32 %v702_v40 }
 0x249   : > { %v720_v30 = vpop.xlane.xlu1 %719  ;;  %1107 = vrcp.f32 %v698_v26 }
 0x24a   : > { %1109 = vrcp.f32 %v706_v42 }
 0x24b   : > { %1111 = vrcp.f32 %v712_v36 }
 0x24d   : > { %v718_v48 = vpop.xlane.xlu0 %717  ;;  %v1104_v49 = vpop.eup %1103 }
 0x24e   : > { %v1106_v54 = vpop.eup %1105  ;;  %v747_v56 = vmul.f32 %v1104_v49, %v1529_v58 }
 0x24f   : > { %v1108_v41 = vpop.eup %1107  ;;  %v746_v0 = vmul.f32 %v1106_v54, %v1518_v57 }
 0x250   : > { %v1110_v59 = vpop.eup %1109  ;;  %v744_v52 = vmul.f32 %v1108_v41, %v1502_v28  ;;  %v767_v38 = vadd.f32 %v763_v61, %v747_v56 }
 0x251   : > { %v708_v33 = vpop.xlane.xlu1 %707  ;;  %v1112_v60 = vpop.eup %1111  ;;  %v748_v1 = vmul.f32 %v1110_v59, %v1527_v4 }
 0x252   : > { %1113 = vrcp.f32 %v708_v33  ;;  %v751_v7 = vmul.f32 %v1112_v60, %v1506_v45  ;;  %v764_v8 = vadd.f32 %v746_v0, %v744_v52 }
 0x253   : > { %1115 = vrcp.f32 %v716_v27 }
 0x254   : > { %1117 = vrcp.f32 %v720_v30  ;;  %v768_v2 = vadd.f32 %v764_v8, %v748_v1 }
 0x255   : > { %v710_v46 = vpop.xlane.xlu2 %709 }
 0x256   : > { %1119 = vrcp.f32 %v710_v46 }
 0x257   : > { %1121 = vrcp.f32 %v714_v37 }
 0x258   : > { %v1114_v53 = vpop.eup %1113 }
 0x259   : > { %v749_v3 = vmul.f32 %v1114_v53, %v1090_v20  ;;  %v724_v6 = vpop.xlane.xlu0 %723  ;;  %v1116_v35 = vpop.eup %1115 }
 0x25a   : > { %1123 = vrcp.f32 %v724_v6  ;;  %v1118_v58 = vpop.eup %1117  ;;  %v753_v57 = vmul.f32 %v1116_v35, %v1522_v63 }
 0x25b   : > { %v771_v9 = vadd.f32 %v767_v38, %v749_v3  ;;  %1125 = vrcp.f32 %v718_v48  ;;  %v755_v16 = vmul.f32 %v1118_v58, %v1534_v62 }
 0x25c   : > { %v1120_v10 = vpop.eup %1119 }
 0x25d   : > { %v775_v14 = vadd.f32 %v771_v9, %v751_v7  ;;  %v750_v28 = vmul.f32 %v1120_v10, %v1543_v24  ;;  %v722_v4 = vpop.xlane.xlu2 %721  ;;  %v1122_v15 = vpop.eup %1121 }
 0x25e   : > { %1127 = vrcp.f32 %v722_v4  ;;  %v752_v21 = vmul.f32 %v1122_v15, %v1512_v50 }
 0x25f   : > { %v772_v20 = vadd.f32 %v768_v2, %v750_v28  ;;  %v779_v5 = vadd.f32 %v775_v14, %v753_v57 }
 0x260   : > { %v1124_v45 = vpop.eup %1123 }
 0x261   : > { %v783_v23 = vadd.f32 %v779_v5, %v755_v16  ;;  %v757_v63 = vmul.f32 %v1124_v45, %v1547_v31  ;;  %v726_v17 = vpop.xlane.xlu1 %725  ;;  %v1126_v11 = vpop.eup %1125  ;;  %v776_v24 = vadd.f32 %v772_v20, %v752_v21 }
 0x262   : > { %1129 = vrcp.f32 %v726_v17  ;;  %v754_v62 = vmul.f32 %v1126_v11, %v1538_v12 }
 0x263   : > { %v787_v29 = vadd.f32 %v783_v23, %v757_v63 }
 0x264   : > { %v1128_v32 = vpop.eup %1127  ;;  %v780_v26 = vadd.f32 %v776_v24, %v754_v62 }
 0x265   : > { %v791_v34 = vmul.f32 0.125, %v787_v29  ;;  %v756_v36 = vmul.f32 %v1128_v32, %v1550_v19 }
 0x267   : > { %v793_v50 = vsel %vm596_vm1, %v791_v34, %v1475_v18  ;;  %v784_v37 = vadd.f32 %v780_v26, %v756_v36 }
 0x268   : > { %v1130_v31 = vpop.eup %1129  ;;  %795 = vst [vmem:[%s289_s11] sm:$0xff] %v793_v50 }
 0x269   : > { %v758_v12 = vmul.f32 %v1130_v31, %v1553_v22 }
 0x26b   : > { %v788_v19 = vadd.f32 %v784_v37, %v758_v12 }
 0x26d   : > { %v792_v39 = vmul.f32 0.125, %v788_v19 }
 0x26f   : > { %v794_v18 = vsel %vm596_vm1, %v792_v39, %v1488_v13 }
 0x270   : > { %796 = vst [vmem:[%s289_s11 + $0x8] sm:$0xff] %v794_v18 }
 0x271   : > { %1158 = shalt.err (!%p1155_p5)
}
 0x272   : > { %s1211_s19 = smov 128   ;;  %s1212_s28 = smov 8  }
 0x273   : > { %1007 = dma.vmem_to_hbm [thread:$0]  (%p1288_p4), %s813_s24, 256, %s815_s12, %s798_s13, %s1211_s19, %s1211_s19, %s1212_s28  }
 0x274 PF: > { %p1013_p6 = scmp.ge.s32.totalorder %s1209_s26, 2  ;;  %s829_s30 = sand.u32 1, %s1189_s21  }
 0x275   : > { %s830_s8 = scalar_lea.sflag [#allocation3], %s829_s30 }
 0x276   : > { %p1010_p7 = pnand %p1013_p6, %p1295_p8 }
 0x278   : > { %p1011_p9 = pneg %p1010_p7 }
 0x27a   : > { %1184 = dma.done.wait (%p1011_p9), %s830_s8, 256  }
 0x27b   : > { %1186 = vsyncadd (%p1011_p9), %s830_s8, 4294967040  ;;  %s19_s26 = sadd.s32 1, %s1209_s26   ;;  %s1627_s21 = smov %s1193_s22 }
 0x27c   : > { %p16_p10 = scmp.ge.s32.totalorder %s19_s26, 4   ;;  %s1628_s22 = smov %s1197_s23 }
 0x27d   : > { %s1629_s23 = smov %s1301_s10  ;;  %s1630_s24 = smov %s1205_s25 }
 0x27e   : > { %s1631_s25 = smov %s1633_s29  ;;  %18 = sbr.rel (!%p16_p10) target bundleno = 4 (0x4), region = 82 }
 0x283   :  { %836 = vsyncpa [#allocation3], 1 }
 0x284   :  { %838 = vsyncpa [#allocation3 + $0x1], 1 }

</bundles_post_ra>
